<compile_context>
chip_gen: v5e
topology: v5e:2x2
jax: 0.10.0
libtpu: 0.0.40
codegen_flags: <defaults>
</compile_context>

<pallas_src>
import functools
import math

import jax
import jax.numpy as jnp
import numpy as np
from jax.experimental import pallas as pl
from jax.experimental.pallas import tpu as pltpu


def _round_up(x, m):
    return ((x + m - 1) // m) * m


def rgcn_layer_kernel(h_ref, init_ref, bias_ref, repr_ref, node_ref, *,
                      fold, out_dim):
    """Fused bias-add + ReLU + repr packing.

    Each ref row holds `fold` consecutive graph nodes (lane-folded so every
    block is a multiple of 128 lanes and every store is a full-width vst):
      h_ref    : (t, fold*out_dim)     propagated states g.ndata['h']
      init_ref : (t, fold*out_dim)     cat([feat, embed[idx]], dim=1)
      bias_ref : (1, fold*out_dim)     bias tiled `fold` times
      repr_ref : (t, fold*2*out_dim)   row-major layout of (N, 2, out_dim)
      node_ref : (t, fold*out_dim)     relu(h + bias)   (g.ndata['h'] output)
    """
    node = jnp.maximum(h_ref[...] + bias_ref[...], 0)
    node_ref[...] = node.astype(node_ref.dtype)

    init = init_ref[...]
    # Per node n the repr row chunk is [init_n | node_n]; interleave the two
    # lane-dense streams at out_dim granularity, then one unmasked store.
    pieces = []
    for k in range(fold):
        pieces.append(init[:, k * out_dim:(k + 1) * out_dim])
        pieces.append(node[:, k * out_dim:(k + 1) * out_dim])
    repr_ref[...] = jnp.concatenate(pieces, axis=-1).astype(repr_ref.dtype)


def rgcn_layer_forward(h, feat, embed_table, idx, bias, *, tile_rows=4096):
    """Wrapper: embedding gather + init concat in XLA glue, fused epilogue in Pallas.

    Returns (node_repr, repr) matching (g.ndata['h'], g.ndata['repr']).
    """
    N, D = h.shape
    Fd = feat.shape[1]
    Ed = embed_table.shape[1]
    assert Fd + Ed == D, "feat_dim + emb_dim must equal out_dim for the (-1, 2, out_dim) reshape"

    out_dtype = jnp.result_type(h.dtype, feat.dtype, embed_table.dtype, bias.dtype)
    itemsize = jnp.dtype(out_dtype).itemsize
    sublane = 32 // itemsize          # dtype-dependent sublane tile: 8 f32 / 16 bf16 / 32 int8

    # Fold `fold` consecutive nodes into the lane dimension so every block is a
    # multiple of 128 lanes (for out_dim=32: fold=4, h/init -> 128, repr -> 256).
    fold = 128 // math.gcd(128, D)
    rows = pl.cdiv(N, fold)
    n_fold = rows * fold

    # --- XLA glue: data-dependent gather stays out of the kernel (64 B rows are
    # too small for per-row DMA); the concat (+ tiny pad) fuses with the gather.
    init = jnp.concatenate(
        [feat.astype(out_dtype),
         jnp.take(embed_table, idx, axis=0).astype(out_dtype)], axis=1)
    h_in = h.astype(out_dtype)
    if n_fold != N:
        # Pad only to the fold boundary (< fold nodes), not to a tile multiple.
        pad = n_fold - N
        init = jnp.pad(init, ((0, pad), (0, 0)))     # fuses into gather+concat
        h_in = jnp.pad(h_in, ((0, pad), (0, 0)))     # small copy; gone once fused upstream
    h2 = h_in.reshape(rows, fold * D)                # contiguous (free) reshapes
    init2 = init.reshape(rows, fold * D)
    bias2 = jnp.tile(bias.astype(out_dtype), fold).reshape(1, fold * D)

    # --- Tile selection: large tiles, but keep >= 2 grid tiles when there is
    # enough work so dimension_semantics=("parallel",) can shard across v7x's
    # two TensorCores; round to the dtype sublane multiple.
    tile_r = max(sublane, min(int(tile_rows), _round_up(rows, sublane)))
    if rows > 2 * sublane:
        tile_r = min(tile_r, _round_up(pl.cdiv(rows, 2), sublane))
    tile_r = _round_up(tile_r, sublane)
    if tile_r >= rows:
        tile_r = rows                                # single full-extent block
    grid = (pl.cdiv(rows, tile_r),)                  # partial tail block is masked by Pallas

    # VMEM: h + init + repr + node = 5*fold*D lanes/row, double buffered.
    row_bytes = 5 * fold * D * itemsize
    vmem_limit = 2 * tile_r * row_bytes + (4 << 20)  # ~24 MiB at the 4096-row default (f32, D=32)

    kernel = functools.partial(rgcn_layer_kernel, fold=fold, out_dim=D)

    repr2, node2 = pl.pallas_call(
        kernel,
        out_shape=(jax.ShapeDtypeStruct((rows, fold * 2 * D), out_dtype),
                   jax.ShapeDtypeStruct((rows, fold * D), out_dtype)),
        grid_spec=pltpu.PrefetchScalarGridSpec(
            num_scalar_prefetch=0,
            grid=grid,
            in_specs=[
                pl.BlockSpec((tile_r, fold * D), lambda i: (i, 0)),      # h
                pl.BlockSpec((tile_r, fold * D), lambda i: (i, 0)),      # init
                pl.BlockSpec((1, fold * D), lambda i: (0, 0)),           # bias (tiled)
            ],
            out_specs=[
                pl.BlockSpec((tile_r, fold * 2 * D), lambda i: (i, 0)),  # repr
                pl.BlockSpec((tile_r, fold * D), lambda i: (i, 0)),      # node_repr
            ],
        ),
        compiler_params=pltpu.CompilerParams(
            dimension_semantics=("parallel",),       # shards tiles across v7x's 2 TCs
            vmem_limit_bytes=int(vmem_limit)),
    )(h2, init2, bias2)

    # Each folded row is exactly the row-major layout of `fold` nodes of (2, D)
    # / (D,), so these reshapes are contiguous and free; [:N] drops pad nodes.
    repr_full = repr2.reshape(n_fold, 2, D)[:N]
    node_repr = node2.reshape(n_fold, D)[:N]
    return node_repr, repr_full


def reference_forward(h, feat, embed_table, idx, bias):
    """Pure-JAX reference of the same forward semantics."""
    node = jnp.maximum(h + bias[None, :], 0.0)
    init = jnp.concatenate([feat, embed_table[idx]], axis=1)
    x = jnp.concatenate([init, node], axis=1)
    return node, x.reshape(-1, 2, h.shape[1])


if __name__ == "__main__":
    # Small shapes consistent with the module:
    #   out_dim = 32, feat_dim = 16, emb_dim = 16 (feat_dim + emb_dim == out_dim)
    # N deliberately not a multiple of fold(=4) or the sublane tile to exercise
    # the fold pad + partial-last-block paths.
    N = 50            # number of graph nodes
    out_dim = 32
    feat_dim = 16
    emb_dim = 16
    num_nodes = 64    # embedding table rows (stand-in for num_nodes=122343142)

    key = jax.random.PRNGKey(0)
    k_h, k_feat, k_emb, k_idx, k_bias = jax.random.split(key, 5)

    h = jax.random.normal(k_h, (N, out_dim), dtype=jnp.float32)
    feat = jax.random.normal(k_feat, (N, feat_dim), dtype=jnp.float32)
    embed_table = jax.random.normal(k_emb, (num_nodes, emb_dim), dtype=jnp.float32)
    idx = jax.random.randint(k_idx, (N,), 0, num_nodes, dtype=jnp.int32)
    # Deterministic "xavier-like" uniform init for the bias parameter (out_dim,)
    gain = float(np.sqrt(2.0))  # calculate_gain('relu')
    limit = gain * float(np.sqrt(6.0 / (out_dim + out_dim)))
    bias = jax.random.uniform(k_bias, (out_dim,), dtype=jnp.float32,
                              minval=-limit, maxval=limit)

    h_out, repr_out = rgcn_layer_forward(h, feat, embed_table, idx, bias)
    jax.block_until_ready((h_out, repr_out))

    h_ref, repr_ref = reference_forward(h, feat, embed_table, idx, bias)
    np.testing.assert_allclose(np.asarray(h_out), np.asarray(h_ref),
                               rtol=1e-6, atol=1e-6)
    np.testing.assert_allclose(np.asarray(repr_out), np.asarray(repr_ref),
                               rtol=1e-6, atol=1e-6)

    print("KERNEL_OK")
</pallas_src>

<mosaic_0001>
module attributes {stable_mosaic.version = 11 : i64} {
  func.func @rgcn_layer_kernel(%arg0: i32, %arg1: memref<13x128xf32, #tpu.memory_space<vmem>>, %arg2: memref<13x128xf32, #tpu.memory_space<vmem>>, %arg3: memref<1x128xf32, #tpu.memory_space<vmem>>, %arg4: memref<13x256xf32, #tpu.memory_space<vmem>>, %arg5: memref<13x128xf32, #tpu.memory_space<vmem>>) attributes {dimension_semantics = [#tpu.dimension_semantics<parallel>], iteration_bounds = array<i64: 1>, scalar_prefetch = 0 : i64, scratch_operands = 0 : i64, tpu.core_type = #tpu.core_type<tc>, window_params = [{transform_indices = @transform_0, window_bounds = array<i64: 13, 128>}, {transform_indices = @transform_1, window_bounds = array<i64: 13, 128>}, {pipeline_mode = #tpu.pipeline_mode<synchronous>, transform_indices = @transform_2, window_bounds = array<i64: 1, 128>}, {transform_indices = @transform_3, window_bounds = array<i64: 13, 256>}, {transform_indices = @transform_4, window_bounds = array<i64: 13, 128>}]} {
    %c0 = arith.constant 0 : index
    %c0_0 = arith.constant 0 : index
    %0 = vector.load %arg1[%c0, %c0_0] : memref<13x128xf32, #tpu.memory_space<vmem>>, vector<13x128xf32>
    %c0_1 = arith.constant 0 : index
    %c0_2 = arith.constant 0 : index
    %1 = vector.load %arg3[%c0_1, %c0_2] : memref<1x128xf32, #tpu.memory_space<vmem>>, vector<1x128xf32>
    %2 = vector.broadcast %1 : vector<1x128xf32> to vector<13x128xf32>
    %3 = arith.addf %0, %2 : vector<13x128xf32>
    %cst = arith.constant 0.000000e+00 : f32
    %4 = vector.broadcast %cst : f32 to vector<13x128xf32>
    %5 = arith.maximumf %3, %4 : vector<13x128xf32>
    %c0_3 = arith.constant 0 : index
    %c0_4 = arith.constant 0 : index
    %6 = vector.load %arg5[%c0_3, %c0_4] : memref<13x128xf32, #tpu.memory_space<vmem>>, vector<13x128xf32>
    tpu.vector_store %arg5[%c0_3, %c0_4], %5 {strides = array<i32>} : memref<13x128xf32, #tpu.memory_space<vmem>>, vector<13x128xf32>,
    %c0_5 = arith.constant 0 : index
    %c0_6 = arith.constant 0 : index
    %7 = vector.load %arg2[%c0_5, %c0_6] : memref<13x128xf32, #tpu.memory_space<vmem>>, vector<13x128xf32>
    %8 = vector.extract_strided_slice %7 {offsets = [0, 0], sizes = [13, 32], strides = [1, 1]} : vector<13x128xf32> to vector<13x32xf32>
    %9 = vector.extract_strided_slice %5 {offsets = [0, 0], sizes = [13, 32], strides = [1, 1]} : vector<13x128xf32> to vector<13x32xf32>
    %10 = vector.extract_strided_slice %7 {offsets = [0, 32], sizes = [13, 32], strides = [1, 1]} : vector<13x128xf32> to vector<13x32xf32>
    %11 = vector.extract_strided_slice %5 {offsets = [0, 32], sizes = [13, 32], strides = [1, 1]} : vector<13x128xf32> to vector<13x32xf32>
    %12 = vector.extract_strided_slice %7 {offsets = [0, 64], sizes = [13, 32], strides = [1, 1]} : vector<13x128xf32> to vector<13x32xf32>
    %13 = vector.extract_strided_slice %5 {offsets = [0, 64], sizes = [13, 32], strides = [1, 1]} : vector<13x128xf32> to vector<13x32xf32>
    %14 = vector.extract_strided_slice %7 {offsets = [0, 96], sizes = [13, 32], strides = [1, 1]} : vector<13x128xf32> to vector<13x32xf32>
    %15 = vector.extract_strided_slice %5 {offsets = [0, 96], sizes = [13, 32], strides = [1, 1]} : vector<13x128xf32> to vector<13x32xf32>
    %16 = tpu.concatenate %8, %9, %10, %11, %12, %13, %14, %15 in 1 : vector<13x32xf32>, vector<13x32xf32>, vector<13x32xf32>, vector<13x32xf32>, vector<13x32xf32>, vector<13x32xf32>, vector<13x32xf32>, vector<13x32xf32> -> vector<13x256xf32>
    %c0_7 = arith.constant 0 : index
    %c0_8 = arith.constant 0 : index
    %17 = vector.load %arg4[%c0_7, %c0_8] : memref<13x256xf32, #tpu.memory_space<vmem>>, vector<13x256xf32>
    tpu.vector_store %arg4[%c0_7, %c0_8], %16 {strides = array<i32>} : memref<13x256xf32, #tpu.memory_space<vmem>>, vector<13x256xf32>,
    return
  }
  func.func @transform_0(%arg0: i32) -> (i32, i32) {
    %c0_i32 = arith.constant 0 : i32
    %c0_i32_0 = arith.constant 0 : i32
    return %arg0, %c0_i32 : i32, i32
  }
  func.func @transform_1(%arg0: i32) -> (i32, i32) {
    %c0_i32 = arith.constant 0 : i32
    %c0_i32_0 = arith.constant 0 : i32
    return %arg0, %c0_i32 : i32, i32
  }
  func.func @transform_2(%arg0: i32) -> (i32, i32) {
    %c0_i32 = arith.constant 0 : i32
    %c0_i32_0 = arith.constant 0 : i32
    %c0_i32_1 = arith.constant 0 : i32
    return %c0_i32, %c0_i32_0 : i32, i32
  }
  func.func @transform_3(%arg0: i32) -> (i32, i32) {
    %c0_i32 = arith.constant 0 : i32
    %c0_i32_0 = arith.constant 0 : i32
    return %arg0, %c0_i32 : i32, i32
  }
  func.func @transform_4(%arg0: i32) -> (i32, i32) {
    %c0_i32 = arith.constant 0 : i32
    %c0_i32_0 = arith.constant 0 : i32
    return %arg0, %c0_i32 : i32, i32
  }
}

</mosaic_0001>

<bundles_post_ra>
// kernel: tpu_custom_call.1
= control target key start
LH: loop header
LB: loop body
LE: loop exit
PB: predicated region body
PF: predicated region fallthrough
CT: control target
= control target key end

     0   :  { %10 = vsyncpa [#allocation3], 0  ;;  %s353_s0 = inlined_call_operand.hbm [shape: f32[13,128], index: 0, kind: input, shape index: {}]   ;;  %s354_s1 = inlined_call_operand.hbm [shape: f32[13,128], index: 1, kind: input, shape index: {}]   ;;  %s355_s2 = inlined_call_operand.vmem [shape: f32[1,128], index: 2, kind: input, shape index: {}]   ;;  %s356_s3 = inlined_call_operand.hbm [shape: f32[13,256], index: 3, kind: output, shape index: {0}]   ;;  %s357_s4 = inlined_call_operand.hbm [shape: f32[13,128], index: 4, kind: output, shape index: {1}]  }
   0x1   :  { %11 = vsyncpa [#allocation6], 0 }
   0x2   :  { %12 = vsyncpa [#allocation4], 0 }
   0x3   :  { %13 = vsyncpa [#allocation9], 0  ;;  %s18_s17 = sshll.u32 %s353_s0, 4  ;;  %s277_s18 = smov [#allocation2]   ;;  %s19_s17 = int_to_ptr.hbm [resolvable:$true] %s18_s17 }
   0x4   :  { %s20_s19 = sshll.u32 %s277_s18, 4  ;;  %s31_s22 = sshll.u32 %s354_s1, 4  ;;  %s21_s19 = int_to_ptr.vmem [resolvable:$true] %s20_s19  ;;  %s32_s22 = int_to_ptr.hbm [resolvable:$true] %s31_s22 }
   0x5   :  { %s278_s23 = smov 128   ;;  %s279_s24 = smov 8  }
   0x6   :  { %26 = dma.hbm_to_vmem [thread:$0]  %s19_s17, 256, %s21_s19, [#allocation3], %s278_s23, %s278_s23, %s279_s24  }
   0x7   :  { %s280_s25 = smov [#allocation5]  }
   0x8   :  { %s33_s26 = sshll.u32 %s280_s25, 4  ;;  %s34_s26 = int_to_ptr.vmem [resolvable:$true] %s33_s26 }
   0x9   :  { %39 = dma.hbm_to_vmem [thread:$0]  %s32_s22, 256, %s34_s26, [#allocation6], %s278_s23, %s278_s23, %s279_s24  }
   0xa   :  { %269 = dma.done.wait [#allocation3], 256  }
   0xb   :  { %270 = vsyncadd [#allocation3], 4294967040 }
   0xc   :  { %271 = dma.done.wait [#allocation6], 256  }
   0xd   :  { %272 = vsyncadd [#allocation6], 4294967040  ;;  %v62_v0 = vld [vmem:[#allocation5] sm:$0xff]  ;;  %v50_v1 = vld [vmem:[#allocation2] sm:$0xff]  ;;  %s281_s0 = smov 64   ;;  %s282_s28 = smov 32  }
   0xe   :  { %86 = vrot.lane.b32.xlu1 %v62_v0, %s281_s0  ;;  %v172_v2 = vld [vmem:[%s355_s2] ss:$0 sm:$0xff]  ;;  %v51_v3 = vld [vmem:[#allocation2 + $0x8] sm:$0x1f]  ;;  %v63_v7 = vld [vmem:[#allocation5 + $0x8] sm:$0x1f] }
   0xf   :  { %v56_v4 = vadd.f32 %v172_v2, %v50_v1  ;;  %v57_v5 = vadd.f32 %v172_v2, %v51_v3  ;;  %s283_s29 = smov 96   ;;  %s284_s30 = smov [#allocation8]   ;;  %vm104_vm0 = vcmask 261120   ;;  %vm107_vm1 = vcmask 523264  }
  0x10   :  { %s140_s5 = sshll.u32 %s284_s30, 4  ;;  %s142_s7 = sshll.u32 %s357_s4, 4  ;;  %vm110_vm2 = vcmask 785408   ;;  %s141_s5 = int_to_ptr.vmem [resolvable:$true] %s140_s5  ;;  %s143_s7 = int_to_ptr.hbm [resolvable:$true] %s142_s7 }
  0x11   :  { %v58_v6 = vmax.f32 %v56_v4, 0.0  ;;  %v59_v8 = vmax.f32 %v57_v5, 0.0  ;;  %s285_s4 = smov [#allocation7]   ;;  %s129_s11 = sshll.u32 %s356_s3, 4  ;;  %s130_s11 = int_to_ptr.hbm [resolvable:$true] %s129_s11 }
  0x12   :  { %s127_s8 = sshll.u32 %s285_s4, 4  ;;  %s286_s12 = smov 256   ;;  %s128_s8 = int_to_ptr.vmem [resolvable:$true] %s127_s8 }
  0x13   :  { %66 = vrot.lane.b32.xlu0 %v58_v6, %s282_s28  ;;  %60 = vst [vmem:[#allocation8] sm:$0xff] %v58_v6  ;;  %92 = vrot.lane.b32.xlu2 %v58_v6, %s283_s29  ;;  %s287_s13 = smov 16  }
  0x14   :  { %61 = vst [vmem:[#allocation8 + $0x8] sm:$0x1f] %v59_v8 }
  0x15   :  { %148 = dma.vmem_to_hbm [thread:$0]  %s141_s5, 256, %s143_s7, [#allocation9], %s278_s23, %s278_s23, %s279_s24  }
  0x16   :  { %88 = vrot.lane.b32.xlu1 %v63_v7, %s281_s0 }
  0x1b   :  { %68 = vrot.lane.b32.xlu0 %v59_v8, %s282_s28  ;;  %94 = vrot.lane.b32.xlu2 %v59_v8, %s283_s29 }
  0x1e   :  { %76 = vrot.lane.b32.xlu1 %v63_v7, %s282_s28 }
  0x23   :  { %74 = vrot.lane.b32.xlu0 %v62_v0, %s282_s28  ;;  %98 = vrot.lane.b32.xlu2 %v62_v0, %s283_s29 }
  0x26   :  { %80 = vrot.lane.b32.xlu1 %v58_v6, %s281_s0 }
  0x2b   :  { %100 = vrot.lane.b32.xlu0 %v63_v7, %s283_s29  ;;  %82 = vrot.lane.b32.xlu2 %v59_v8, %s281_s0 }
  0x6d   :  { %v93_v9 = vpop.permute.xlu2 %92 }
  0x75   :  { %v95_v10 = vpop.permute.xlu2 %94 }
  0x7d   :  { %v99_v11 = vpop.permute.xlu2 %98 }
  0x80   :  { %v87_v12 = vpop.permute.xlu1 %86 }
  0x81   :  { %v113_v13 = vsel %vm104_vm0, %v87_v12, %v93_v9 }
  0x82   :  { %v115_v14 = vsel %vm107_vm1, %v113_v13, %v99_v11 }
  0x83   :  { %v117_v15 = vsel %vm110_vm2, %v115_v14, %v58_v6 }
  0x84   :  { %120 = vst [vmem:[#allocation7 + $0x8] sm:$0xff] %v117_v15 }
  0x85   :  { %v67_v16 = vpop.permute.xlu0 %66  ;;  %v83_v19 = vpop.permute.xlu2 %82 }
  0x86   :  { %v105_v25 = vsel %vm104_vm0, %v62_v0, %v67_v16 }
  0x88   :  { %v89_v17 = vpop.permute.xlu1 %88 }
  0x89   :  { %v114_v29 = vsel %vm104_vm0, %v89_v17, %v95_v10 }
  0x8d   :  { %v69_v18 = vpop.permute.xlu0 %68 }
  0x8e   :  { %v106_v20 = vsel %vm104_vm0, %v63_v7, %v69_v18 }
  0x90   :  { %v77_v21 = vpop.permute.xlu1 %76 }
  0x91   :  { %v109_v22 = vsel %vm107_vm1, %v106_v20, %v77_v21 }
  0x92   :  { %v112_v23 = vsel %vm110_vm2, %v109_v22, %v83_v19 }
  0x93   :  { %121 = vst [vmem:[#allocation7 + $0x10] sm:$0x1f] %v112_v23 }
  0x95   :  { %v75_v24 = vpop.permute.xlu0 %74 }
  0x96   :  { %v108_v26 = vsel %vm107_vm1, %v105_v25, %v75_v24 }
  0x98   :  { %v81_v27 = vpop.permute.xlu1 %80 }
  0x99   :  { %v111_v28 = vsel %vm110_vm2, %v108_v26, %v81_v27 }
  0x9a   :  { %119 = vst [vmem:[#allocation7] sm:$0xff] %v111_v28 }
  0x9d   :  { %v101_v30 = vpop.permute.xlu0 %100 }
  0x9e   :  { %v116_v31 = vsel %vm107_vm1, %v114_v29, %v101_v30 }
  0x9f   :  { %v118_v32 = vsel %vm110_vm2, %v116_v31, %v59_v8 }
  0xa0   :  { %122 = vst [vmem:[#allocation7 + $0x18] sm:$0x1f] %v118_v32 }
  0xa1   :  { %135 = dma.vmem_to_hbm [thread:$0]  %s128_s8, 512, %s130_s11, [#allocation4], %s286_s12, %s286_s12, %s287_s13  }
  0xa2   :  { %273 = dma.done.wait [#allocation4], 512  }
  0xa3   :  { %274 = vsyncadd [#allocation4], 4294966784 }
  0xa4   :  { %275 = dma.done.wait [#allocation9], 256  }
  0xa5   :  { %276 = vsyncadd [#allocation9], 4294967040 }
  0xa6   :  { %157 = vsyncpa [#allocation3], 1 }
  0xa7   :  { %158 = vsyncpa [#allocation6], 1 }
  0xa8   :  { %159 = vsyncpa [#allocation4], 1 }
  0xa9   :  { %160 = vsyncpa [#allocation9], 1 }

</bundles_post_ra>
